<compile_context>
chip_gen: v5e
topology: v5e:2x2
jax: 0.10.0
libtpu: 0.0.40
codegen_flags: <defaults>
</compile_context>

<pallas_src>
import functools

import jax
import jax.numpy as jnp
from jax.experimental import pallas as pl
from jax.experimental.pallas import tpu as pltpu

_LANE = 128


def _sigmoid_kernel(x_ref, o_ref):
    x = x_ref[...]
    # Compute in f32 (no-op cast for f32 inputs); exp lands on the EUP.
    xf = x.astype(jnp.float32)
    o_ref[...] = jax.nn.sigmoid(xf).astype(o_ref.dtype)


@functools.lru_cache(maxsize=1)
def _chip_kind() -> str:
    try:
        return jax.devices()[0].device_kind.lower()
    except Exception:
        return ""


def _per_buffer_target_bytes() -> int:
    """Generation-aware per-buffer block byte target."""
    kind = _chip_kind()
    if ("v7" in kind) or ("v6" in kind):
        # v7x ~3.2 TB/s, v6e ~1.4 TB/s: 4 MiB blocks keep the ~0.35 us/step
        # overhead under ~10%.  4 buffers x 4 MiB = 16 MiB < 32 MiB scoped VMEM.
        return 4 * 1024 * 1024
    # v5e (16 MiB scoped-VMEM default) and unknown chips: stay at 2 MiB/buffer.
    return 2 * 1024 * 1024


def _min_grid_blocks() -> int:
    # v7x has 2 TensorCores per chip; give the "parallel" axis >= 2 blocks so
    # medium-sized tensors can be sharded across both cores.
    return 2 if "v7" in _chip_kind() else 1


def _round_up(a: int, m: int) -> int:
    return ((a + m - 1) // m) * m


def sigmoid_pallas(x: jax.Array) -> jax.Array:
    """Elementwise sigmoid via a Pallas TPU kernel (float dtypes)."""
    if x.size == 0:
        return x

    orig_shape = x.shape
    if x.ndim == 0:
        x = x.reshape(1)

    n = x.size
    itemsize = jnp.dtype(x.dtype).itemsize

    # Flatten; pad the tail (<128 elements, essentially free) so the flat size
    # is lane-divisible and always takes the roofline-tuned tiled path.
    x_flat = x.reshape(-1)
    pad = (-n) % _LANE
    if pad:
        x_flat = jnp.concatenate([x_flat, jnp.zeros((pad,), dtype=x.dtype)])
    n_padded = n + pad

    # Widest lane-multiple row width that divides the flat size.
    width = _LANE
    for w in (1024, 512, 256):
        if n_padded % w == 0:
            width = w
            break
    rows = n_padded // width
    x2d = x_flat.reshape(rows, width)   # free reshape (contiguous) on common path

    # Per-buffer block target rows (multiple of 8 sublanes).
    row_bytes = width * itemsize
    target_rows = max(8, (_per_buffer_target_bytes() // row_bytes) // 8 * 8)

    min_blocks = _min_grid_blocks()
    if rows <= target_rows:
        if min_blocks > 1 and rows >= 8 * min_blocks:
            # Fits in one tile, but split so both v7x TensorCores get work.
            tile_rows = min(rows, max(8, _round_up(-(-rows // min_blocks), 8)))
        else:
            # Whole slab as one block (full-dim block is always legal).
            tile_rows = rows
    else:
        tile_rows = target_rows
    grid = (pl.cdiv(rows, tile_rows),)

    cost = pl.CostEstimate(
        flops=2 * n_padded,
        transcendentals=n_padded,           # one exp per element (EUP)
        bytes_accessed=2 * n_padded * itemsize,
    )

    out2d = pl.pallas_call(
        _sigmoid_kernel,
        out_shape=jax.ShapeDtypeStruct((rows, width), x.dtype),
        grid=grid,
        in_specs=[pl.BlockSpec((tile_rows, width), lambda i: (i, 0))],
        out_specs=pl.BlockSpec((tile_rows, width), lambda i: (i, 0)),
        compiler_params=pltpu.CompilerParams(
            dimension_semantics=("parallel",)
        ),
        cost_estimate=cost,
    )(x2d)

    out_flat = out2d.reshape(-1)
    if pad:
        out_flat = out_flat[:n]
    return out_flat.reshape(orig_shape)


if __name__ == "__main__":
    key = jax.random.PRNGKey(0)
    # Small NCHW input consistent with the module's elementwise forward.
    x = jax.random.normal(key, (2, 4, 16, 16), dtype=jnp.float32)

    out = sigmoid_pallas(x)
    jax.block_until_ready(out)

    # Correctness check against pure-JAX reference.
    ref = jax.nn.sigmoid(x)
    assert out.shape == x.shape and out.dtype == x.dtype
    assert jnp.max(jnp.abs(out - ref)) < 1e-6

    # Also exercise a non-128-divisible flat size (pad + slice path).
    x_odd = jax.random.normal(jax.random.PRNGKey(1), (3, 5, 7), dtype=jnp.float32)
    out_odd = sigmoid_pallas(x_odd)
    jax.block_until_ready(out_odd)
    assert jnp.max(jnp.abs(out_odd - jax.nn.sigmoid(x_odd))) < 1e-6

    print("KERNEL_OK")
</pallas_src>

<mosaic_0001>
module attributes {stable_mosaic.version = 11 : i64} {
  func.func @_sigmoid_kernel(%arg0: i32, %arg1: memref<2x1024xf32, #tpu.memory_space<vmem>>, %arg2: memref<2x1024xf32, #tpu.memory_space<vmem>>) attributes {dimension_semantics = [#tpu.dimension_semantics<parallel>], iteration_bounds = array<i64: 1>, scalar_prefetch = 0 : i64, scratch_operands = 0 : i64, tpu.core_type = #tpu.core_type<tc>, window_params = [{transform_indices = @transform_0, window_bounds = array<i64: 2, 1024>}, {transform_indices = @transform_1, window_bounds = array<i64: 2, 1024>}]} {
    %c0 = arith.constant 0 : index
    %c0_0 = arith.constant 0 : index
    %0 = vector.load %arg1[%c0, %c0_0] : memref<2x1024xf32, #tpu.memory_space<vmem>>, vector<2x1024xf32>
    %1 = arith.negf %0 : vector<2x1024xf32>
    %2 = math.exp %1 : vector<2x1024xf32>
    %cst = arith.constant 1.000000e+00 : f32
    %3 = vector.broadcast %cst : f32 to vector<2x1024xf32>
    %4 = arith.addf %3, %2 : vector<2x1024xf32>
    %5 = arith.divf %3, %4 : vector<2x1024xf32>
    %c0_1 = arith.constant 0 : index
    %c0_2 = arith.constant 0 : index
    %6 = vector.load %arg2[%c0_1, %c0_2] : memref<2x1024xf32, #tpu.memory_space<vmem>>, vector<2x1024xf32>
    tpu.vector_store %arg2[%c0_1, %c0_2], %5 {strides = array<i32>} : memref<2x1024xf32, #tpu.memory_space<vmem>>, vector<2x1024xf32>,
    return
  }
  func.func @transform_0(%arg0: i32) -> (i32, i32) {
    %c0_i32 = arith.constant 0 : i32
    %c0_i32_0 = arith.constant 0 : i32
    return %arg0, %c0_i32 : i32, i32
  }
  func.func @transform_1(%arg0: i32) -> (i32, i32) {
    %c0_i32 = arith.constant 0 : i32
    %c0_i32_0 = arith.constant 0 : i32
    return %arg0, %c0_i32 : i32, i32
  }
}

</mosaic_0001>

<bundles_post_ra>
// kernel: tpu_custom_call.1
= control target key start
LH: loop header
LB: loop body
LE: loop exit
PB: predicated region body
PF: predicated region fallthrough
CT: control target
= control target key end

     0   :  { %6 = vsyncpa [#allocation3], 0  ;;  %s164_s0 = inlined_call_operand.hbm [shape: f32[2,1024], index: 0, kind: input, shape index: {}]   ;;  %s165_s1 = inlined_call_operand.hbm [shape: f32[2,1024], index: 1, kind: output, shape index: {}]  }
   0x1   :  { %7 = vsyncpa [#allocation4], 0  ;;  %s13_s8 = sshll.u32 %s164_s0, 4  ;;  %s146_s9 = smov [#allocation2]   ;;  %s14_s8 = int_to_ptr.hbm [resolvable:$true] %s13_s8 }
   0x2   :  { %s15_s10 = sshll.u32 %s146_s9, 4  ;;  %s16_s10 = int_to_ptr.vmem [resolvable:$true] %s15_s10 }
   0x3   :  { %18 = dma.hbm_to_vmem [thread:$0]  %s14_s8, 256, %s16_s10, [#allocation3]  }
   0x4   :  { %142 = dma.done.wait [#allocation3], 256  }
   0x5   :  { %143 = vsyncadd [#allocation3], 4294967040  ;;  %v23_v0 = vld [vmem:[#allocation2] sm:$0xff]  ;;  %v24_v1 = vld [vmem:[#allocation2 + $0x8] sm:$0xff]  ;;  %s147_s0 = smov [#allocation5]   ;;  %s72_s14 = sshll.u32 %s165_s1, 4  ;;  %s73_s14 = int_to_ptr.hbm [resolvable:$true] %s72_s14 }
   0x6   :  { %v82_v2 = vmul.f32 -1.442695, %v23_v0  ;;  %v83_v3 = vmul.f32 -1.442695, %v24_v1  ;;  %s70_s11 = sshll.u32 %s147_s0, 4  ;;  %s71_s11 = int_to_ptr.vmem [resolvable:$true] %s70_s11 }
   0x8   :  { %86 = vpow2.f32 %v82_v2 }
   0x9   :  { %88 = vpow2.f32 %v83_v3 }
   0xe   :  { %v87_v4 = vpop.eup %86 }
   0xf   :  { %v89_v5 = vpop.eup %88  ;;  %v31_v6 = vadd.f32 1.0, %v87_v4 }
  0x10   :  { %v32_v7 = vadd.f32 1.0, %v89_v5 }
  0x11   :  { %90 = vrcp.f32 %v31_v6  ;;  %vm38_vm0 = vweird.f32 %v31_v6  ;;  %v44_v11 = vand.u32 2147483648, %v31_v6  ;;  %v42_v14 = vand.u32 2147483647, %v31_v6 }
  0x12   :  { %92 = vrcp.f32 %v32_v7  ;;  %v59_v15 = vand.u32 2147483648, %v32_v7  ;;  %vm53_vm2 = vweird.f32 %v32_v7  ;;  %v57_v17 = vand.u32 2147483647, %v32_v7 }
  0x13   :  { %v45_v19 = vor.u32 1.1754944e-38, %v44_v11  ;;  %vm43_vm5 = vcmp.eq.f32.partialorder %v42_v14, 8.507059e+37 }
  0x14   :  { %v60_v22 = vor.u32 1.1754944e-38, %v59_v15  ;;  %vm58_vm7 = vcmp.eq.f32.partialorder %v57_v17, 8.507059e+37 }
  0x17   :  { %v91_v8 = vpop.eup %90 }
  0x18   :  { %v93_v9 = vpop.eup %92  ;;  %v34_v10 = vmul.f32 %v91_v8, %v31_v6  ;;  %vm39_vm1 = vweird.f32 %v91_v8 }
  0x19   :  { %v49_v12 = vmul.f32 %v93_v9, %v32_v7  ;;  %vm54_vm3 = vweird.f32 %v93_v9  ;;  %vm40_vm4 = vmor %vm38_vm0, %vm39_vm1 }
  0x1a   :  { %v35_v13 = vsub.f32 1.0, %v34_v10  ;;  %vm55_vm6 = vmor %vm53_vm2, %vm54_vm3 }
  0x1b   :  { %v50_v16 = vsub.f32 1.0, %v49_v12 }
  0x1c   :  { %v36_v18 = vmul.f32 %v91_v8, %v35_v13 }
  0x1d   :  { %v51_v20 = vmul.f32 %v93_v9, %v50_v16 }
  0x1e   :  { %v37_v21 = vadd.f32 %v91_v8, %v36_v18 }
  0x1f   :  { %v52_v23 = vadd.f32 %v93_v9, %v51_v20 }
  0x20   :  { %v41_v24 = vsel %vm40_vm4, %v91_v8, %v37_v21 }
  0x21   :  { %v46_v25 = vsel %vm43_vm5, %v45_v19, %v41_v24  ;;  %v56_v26 = vsel %vm55_vm6, %v93_v9, %v52_v23 }
  0x22   :  { %63 = vst [vmem:[#allocation5] sm:$0xff] %v46_v25  ;;  %v61_v27 = vsel %vm58_vm7, %v60_v22, %v56_v26 }
  0x23   :  { %64 = vst [vmem:[#allocation5 + $0x8] sm:$0xff] %v61_v27 }
  0x24   :  { %75 = dma.vmem_to_hbm [thread:$0]  %s71_s11, 256, %s73_s14, [#allocation4]  }
  0x25   :  { %144 = dma.done.wait [#allocation4], 256  }
  0x26   :  { %145 = vsyncadd [#allocation4], 4294967040 }
  0x27   :  { %80 = vsyncpa [#allocation3], 1 }
  0x28   :  { %81 = vsyncpa [#allocation4], 1 }

</bundles_post_ra>
